<compile_context>
chip_gen: v7x
topology: tpu7x:2x2x1
jax: 0.10.0
libtpu: 0.0.40
codegen_flags: <defaults>
</compile_context>

<pallas_src>
import functools

import jax
import jax.numpy as jnp
from jax import lax
from jax.experimental import pallas as pl
from jax.experimental.pallas import tpu as pltpu


def _round_hidden(hidden_dim: int, multiple_of: int, ffn_dim_multiplier):
    """Same hidden_dim computation as FeedForward.__init__."""
    hidden_dim = int(2 * hidden_dim / 3)
    if ffn_dim_multiplier is not None:
        hidden_dim = int(ffn_dim_multiplier * hidden_dim)
    hidden_dim = multiple_of * ((hidden_dim + multiple_of - 1) // multiple_of)
    return hidden_dim


def ffn_kernel(x_ref, w1_ref, w3_ref, w2_ref, o_ref, acc_ref):
    # x_ref:  (tm, dim)          activation tile (bf16)
    # w1_ref: (th, dim)          W1 tile, PyTorch (out, in) layout (bf16)
    # w3_ref: (th, dim)          W3 tile (bf16)
    # w2_ref: (dim, th)          W2 tile, PyTorch (out, in) layout (bf16)
    # o_ref:  (tm, dim)          output tile (activation dtype)
    # acc_ref:(tm, dim) f32      VMEM accumulator across hidden tiles
    h = pl.program_id(1)

    @pl.when(h == 0)
    def _():
        acc_ref[...] = jnp.zeros_like(acc_ref)

    x = x_ref[...]
    # Contract on the `dim` axis of both operands -> (tm, th), f32 accumulation
    # on the MXU.  No weight transpose needed.
    dnums = (((1,), (1,)), ((), ()))
    h1 = lax.dot_general(x, w1_ref[...], dnums, preferred_element_type=jnp.float32)
    h3 = lax.dot_general(x, w3_ref[...], dnums, preferred_element_type=jnp.float32)

    # SiLU(h1) * h3 in f32 (sigmoid rides the EUP slot, multiplies on the VPU).
    gated = (h1 * jax.nn.sigmoid(h1)) * h3

    # (tm, th) x (dim, th)^T -> (tm, dim) partial of the down-projection.
    partial = lax.dot_general(
        gated.astype(w2_ref.dtype), w2_ref[...], dnums,
        preferred_element_type=jnp.float32)
    acc_ref[...] += partial

    @pl.when(h == pl.num_programs(1) - 1)
    def _():
        o_ref[...] = acc_ref[...].astype(o_ref.dtype)


@functools.partial(
    jax.jit,
    static_argnames=("tm", "th", "compute_dtype", "vmem_limit_bytes"))
def feed_forward(x, w1, w2, w3, *, tm=256, th=1024,
                 compute_dtype=jnp.bfloat16,
                 vmem_limit_bytes=64 * 1024 * 1024):
    """LLaMA SwiGLU FFN.

    x:  [B, S, dim]
    w1: [hidden, dim]  (PyTorch nn.Linear layout, out x in)
    w2: [dim, hidden]
    w3: [hidden, dim]

    For best performance pass the weights already in `compute_dtype` (bf16) so
    no per-call conversion copy is materialized in HBM.
    """
    B, S, dim = x.shape
    hidden = w1.shape[0]
    tokens = B * S
    out_dtype = x.dtype

    # Clamp tiles for small problems; tiles must evenly divide.
    tm = min(tm, tokens)
    th = min(th, hidden)
    assert tokens % tm == 0, "token count must be divisible by the token tile"
    assert hidden % th == 0, "hidden dim must be divisible by the hidden tile"

    # Cast matmul operands to the compute dtype (no-op if already cast).
    x2d = x.reshape(tokens, dim).astype(compute_dtype)
    w1c = w1.astype(compute_dtype)
    w2c = w2.astype(compute_dtype)
    w3c = w3.astype(compute_dtype)

    w_bytes = jnp.dtype(compute_dtype).itemsize
    x_bytes = jnp.dtype(compute_dtype).itemsize
    o_bytes = jnp.dtype(out_dtype).itemsize
    cost = pl.CostEstimate(
        flops=6 * tokens * dim * hidden,             # three matmuls
        transcendentals=tokens * hidden,             # sigmoid
        bytes_accessed=(tokens * dim * (x_bytes + o_bytes)
                        + 3 * dim * hidden * w_bytes),
    )

    grid = (tokens // tm, hidden // th)

    out2d = pl.pallas_call(
        ffn_kernel,
        out_shape=jax.ShapeDtypeStruct((tokens, dim), out_dtype),
        grid_spec=pltpu.PrefetchScalarGridSpec(
            num_scalar_prefetch=0,
            grid=grid,
            in_specs=[
                pl.BlockSpec((tm, dim), lambda i, h: (i, 0)),   # x tile
                pl.BlockSpec((th, dim), lambda i, h: (h, 0)),   # W1 tile
                pl.BlockSpec((th, dim), lambda i, h: (h, 0)),   # W3 tile
                pl.BlockSpec((dim, th), lambda i, h: (0, h)),   # W2 tile
            ],
            out_specs=pl.BlockSpec((tm, dim), lambda i, h: (i, 0)),
            scratch_shapes=[pltpu.VMEM((tm, dim), jnp.float32)],
        ),
        compiler_params=pltpu.CompilerParams(
            dimension_semantics=("parallel", "arbitrary"),
            vmem_limit_bytes=vmem_limit_bytes,
        ),
        cost_estimate=cost,
    )(x2d, w1c, w3c, w2c)

    return out2d.reshape(B, S, dim)


if __name__ == "__main__":
    # Small shapes consistent with FeedForward.__init__.
    dim = 128
    hidden_dim_arg = 256
    multiple_of = 128
    ffn_dim_multiplier = None
    hidden = _round_hidden(hidden_dim_arg, multiple_of, ffn_dim_multiplier)  # -> 256

    B, S = 2, 8
    key = jax.random.PRNGKey(0)
    kx, k1, k2, k3 = jax.random.split(key, 4)

    x = jax.random.normal(kx, (B, S, dim), dtype=jnp.float32)
    # PyTorch nn.Linear weight layout: (out_features, in_features).
    w1 = (jax.random.normal(k1, (hidden, dim), dtype=jnp.float32) * 0.02)
    w2 = (jax.random.normal(k2, (dim, hidden), dtype=jnp.float32) * 0.02)
    w3 = (jax.random.normal(k3, (hidden, dim), dtype=jnp.float32) * 0.02)

    # Cast weights to bf16 once, outside the per-call path.
    w1b = w1.astype(jnp.bfloat16)
    w2b = w2.astype(jnp.bfloat16)
    w3b = w3.astype(jnp.bfloat16)

    out = feed_forward(x, w1b, w2b, w3b, tm=256, th=1024)
    jax.block_until_ready(out)
    assert out.shape == (B, S, dim)
    assert out.dtype == x.dtype

    # Reference with the same numerics (bf16 operands, f32 accumulation).
    dnums = (((2,), (1,)), ((), ()))
    xb = x.astype(jnp.bfloat16)
    h1 = lax.dot_general(xb, w1b, dnums, preferred_element_type=jnp.float32)
    h3 = lax.dot_general(xb, w3b, dnums, preferred_element_type=jnp.float32)
    gated = (h1 * jax.nn.sigmoid(h1)) * h3
    ref = lax.dot_general(gated.astype(jnp.bfloat16), w2b, dnums,
                          preferred_element_type=jnp.float32).astype(x.dtype)

    assert jnp.allclose(out, ref, atol=1e-3, rtol=1e-2), "mismatch vs reference"

    print("KERNEL_OK")
</pallas_src>

<mosaic_0001>
module attributes {stable_mosaic.version = 11 : i64} {
  func.func @ffn_kernel(%arg0: i32, %arg1: i32, %arg2: memref<16x128xbf16, #tpu.memory_space<vmem>>, %arg3: memref<256x128xbf16, #tpu.memory_space<vmem>>, %arg4: memref<256x128xbf16, #tpu.memory_space<vmem>>, %arg5: memref<128x256xbf16, #tpu.memory_space<vmem>>, %arg6: memref<16x128xf32, #tpu.memory_space<vmem>>, %arg7: memref<16x128xf32, #tpu.memory_space<vmem>>) attributes {dimension_semantics = [#tpu.dimension_semantics<parallel>, #tpu.dimension_semantics<arbitrary>], iteration_bounds = array<i64: 1, 1>, scalar_prefetch = 0 : i64, scratch_operands = 1 : i64, tpu.core_type = #tpu.core_type<tc>, window_params = [{transform_indices = @transform_0, window_bounds = array<i64: 16, 128>}, {transform_indices = @transform_1, window_bounds = array<i64: 256, 128>}, {transform_indices = @transform_2, window_bounds = array<i64: 256, 128>}, {transform_indices = @transform_3, window_bounds = array<i64: 128, 256>}, {transform_indices = @transform_4, window_bounds = array<i64: 16, 128>}]} {
    %c0_i32 = arith.constant 0 : i32
    %0 = arith.cmpi eq, %arg1, %c0_i32 : i32
    %1 = arith.extui %0 : i1 to i32
    %c0_i32_0 = arith.constant 0 : i32
    %2 = arith.cmpi ne, %1, %c0_i32_0 : i32
    scf.if %2 {
      %cst_17 = arith.constant 0.000000e+00 : f32
      %24 = vector.broadcast %cst_17 : f32 to vector<16x128xf32>
      %c0_18 = arith.constant 0 : index
      %c0_19 = arith.constant 0 : index
      %25 = vector.load %arg7[%c0_18, %c0_19] : memref<16x128xf32, #tpu.memory_space<vmem>>, vector<16x128xf32>
      tpu.vector_store %arg7[%c0_18, %c0_19], %24 {strides = array<i32>} : memref<16x128xf32, #tpu.memory_space<vmem>>, vector<16x128xf32>,
    } else {
    }
    %c0 = arith.constant 0 : index
    %c0_1 = arith.constant 0 : index
    %3 = vector.load %arg2[%c0, %c0_1] : memref<16x128xbf16, #tpu.memory_space<vmem>>, vector<16x128xbf16>
    %c0_2 = arith.constant 0 : index
    %c0_3 = arith.constant 0 : index
    %4 = vector.load %arg3[%c0_2, %c0_3] : memref<256x128xbf16, #tpu.memory_space<vmem>>, vector<256x128xbf16>
    %cst = arith.constant dense<0.000000e+00> : vector<16x256xf32>
    %5 = tpu.matmul %3, %4, %cst {dimension_numbers = #tpu.dot_dimension_numbers<[1], [1], [0], [0], [0, 0, 1, 0], [], []>} : vector<16x128xbf16>, vector<256x128xbf16>, vector<16x256xf32> -> vector<16x256xf32>
    %c0_4 = arith.constant 0 : index
    %c0_5 = arith.constant 0 : index
    %6 = vector.load %arg4[%c0_4, %c0_5] : memref<256x128xbf16, #tpu.memory_space<vmem>>, vector<256x128xbf16>
    %cst_6 = arith.constant dense<0.000000e+00> : vector<16x256xf32>
    %7 = tpu.matmul %3, %6, %cst_6 {dimension_numbers = #tpu.dot_dimension_numbers<[1], [1], [0], [0], [0, 0, 1, 0], [], []>} : vector<16x128xbf16>, vector<256x128xbf16>, vector<16x256xf32> -> vector<16x256xf32>
    %8 = arith.negf %5 : vector<16x256xf32>
    %9 = math.exp %8 : vector<16x256xf32>
    %cst_7 = arith.constant 1.000000e+00 : f32
    %10 = vector.broadcast %cst_7 : f32 to vector<16x256xf32>
    %11 = arith.addf %10, %9 : vector<16x256xf32>
    %12 = arith.divf %10, %11 : vector<16x256xf32>
    %13 = arith.mulf %5, %12 : vector<16x256xf32>
    %14 = arith.mulf %13, %7 : vector<16x256xf32>
    %15 = arith.truncf %14 : vector<16x256xf32> to vector<16x256xbf16>
    %c0_8 = arith.constant 0 : index
    %c0_9 = arith.constant 0 : index
    %16 = vector.load %arg5[%c0_8, %c0_9] : memref<128x256xbf16, #tpu.memory_space<vmem>>, vector<128x256xbf16>
    %cst_10 = arith.constant dense<0.000000e+00> : vector<16x128xf32>
    %17 = tpu.matmul %15, %16, %cst_10 {dimension_numbers = #tpu.dot_dimension_numbers<[1], [1], [0], [0], [0, 0, 1, 0], [], []>} : vector<16x256xbf16>, vector<128x256xbf16>, vector<16x128xf32> -> vector<16x128xf32>
    %c0_11 = arith.constant 0 : index
    %c0_12 = arith.constant 0 : index
    %18 = vector.load %arg7[%c0_11, %c0_12] : memref<16x128xf32, #tpu.memory_space<vmem>>, vector<16x128xf32>
    %19 = arith.addf %18, %17 : vector<16x128xf32>
    %c0_13 = arith.constant 0 : index
    %c0_14 = arith.constant 0 : index
    %20 = vector.load %arg7[%c0_13, %c0_14] : memref<16x128xf32, #tpu.memory_space<vmem>>, vector<16x128xf32>
    tpu.vector_store %arg7[%c0_13, %c0_14], %19 {strides = array<i32>} : memref<16x128xf32, #tpu.memory_space<vmem>>, vector<16x128xf32>,
    %c0_i32_15 = arith.constant 0 : i32
    %21 = arith.cmpi eq, %arg1, %c0_i32_15 : i32
    %22 = arith.extui %21 : i1 to i32
    %c0_i32_16 = arith.constant 0 : i32
    %23 = arith.cmpi ne, %22, %c0_i32_16 : i32
    scf.if %23 {
      %c0_17 = arith.constant 0 : index
      %c0_18 = arith.constant 0 : index
      %24 = vector.load %arg7[%c0_17, %c0_18] : memref<16x128xf32, #tpu.memory_space<vmem>>, vector<16x128xf32>
      %c0_19 = arith.constant 0 : index
      %c0_20 = arith.constant 0 : index
      %25 = vector.load %arg6[%c0_19, %c0_20] : memref<16x128xf32, #tpu.memory_space<vmem>>, vector<16x128xf32>
      tpu.vector_store %arg6[%c0_19, %c0_20], %24 {strides = array<i32>} : memref<16x128xf32, #tpu.memory_space<vmem>>, vector<16x128xf32>,
    } else {
    }
    return
  }
  func.func @transform_0(%arg0: i32, %arg1: i32) -> (i32, i32) {
    %c0_i32 = arith.constant 0 : i32
    %c0_i32_0 = arith.constant 0 : i32
    return %arg0, %c0_i32 : i32, i32
  }
  func.func @transform_1(%arg0: i32, %arg1: i32) -> (i32, i32) {
    %c0_i32 = arith.constant 0 : i32
    %c0_i32_0 = arith.constant 0 : i32
    return %arg1, %c0_i32 : i32, i32
  }
  func.func @transform_2(%arg0: i32, %arg1: i32) -> (i32, i32) {
    %c0_i32 = arith.constant 0 : i32
    %c0_i32_0 = arith.constant 0 : i32
    return %arg1, %c0_i32 : i32, i32
  }
  func.func @transform_3(%arg0: i32, %arg1: i32) -> (i32, i32) {
    %c0_i32 = arith.constant 0 : i32
    %c0_i32_0 = arith.constant 0 : i32
    return %c0_i32, %arg1 : i32, i32
  }
  func.func @transform_4(%arg0: i32, %arg1: i32) -> (i32, i32) {
    %c0_i32 = arith.constant 0 : i32
    %c0_i32_0 = arith.constant 0 : i32
    return %arg0, %c0_i32 : i32, i32
  }
}

</mosaic_0001>

<bundles_post_ra>
// kernel: feed_forward.1
= control target key start
LH: loop header
LB: loop body
LE: loop exit
PB: predicated region body
PF: predicated region fallthrough
CT: control target
= control target key end

     0   :  { %9 = vsyncpa [#allocation4], 0  ;;  %s1045_s0 = inlined_call_operand.hbm [shape: bf16[16,128], index: 0, kind: input, shape index: {}]   ;;  %s1046_s1 = inlined_call_operand.hbm [shape: bf16[256,128], index: 1, kind: input, shape index: {}]   ;;  %s1047_s2 = inlined_call_operand.hbm [shape: bf16[256,128], index: 2, kind: input, shape index: {}]   ;;  %s1048_s3 = inlined_call_operand.hbm [shape: bf16[128,256], index: 3, kind: input, shape index: {}]   ;;  %s1049_s4 = inlined_call_operand.hbm [shape: f32[16,128], index: 4, kind: output, shape index: {}]  }
   0x1   :  { %10 = vsyncpa [#allocation7], 0 }
   0x2   :  { %11 = vsyncpa [#allocation10], 0 }
   0x3   :  { %12 = vsyncpa [#allocation5], 0  ;;  %s922_s15 = smov [#allocation6]   ;;  %s923_s17 = smov [#allocation3]  }
   0x4   :  { %s30_s16 = sshll.u32 %s922_s15, 4  ;;  %s18_s18 = sshll.u32 %s923_s17, 4  ;;  %s31_s16 = int_to_ptr.vmem [resolvable:$true] %s30_s16  ;;  %s956_s18 = int_to_ptr.vmem [resolvable:$true] %s18_s18 }
   0x5   :  { %s804_s21 = scalar_lea.hbm %s1046_s1, 2048 }
   0x6   :  { %p805_p0 = scmp.ne.s32.totalorder %s1046_s1, %s804_s21  ;;  %p808_p1 = scmp.lt.u32.totalorder %s804_s21, %s1046_s1 }
   0x8   :  { %p810_p2 = pnand %p808_p1, %p805_p0 }
   0xa   :  { %813 = shalt.err (!%p810_p2)
}
   0xb   :  { %s814_s26 = scalar_lea.vmem %s31_s16, 2048  ;;  %p819_p4 = scmp.lt.s32.totalorder %s31_s16, %s31_s16 }
   0xc   :  { %p815_p3 = scmp.ne.s32.totalorder %s31_s16, %s814_s26  ;;  %p820_p5 = scmp.lt.s32.totalorder %s814_s26, %s814_s26 }
   0xe   :  { %p821_p6 = por %p820_p5, %p819_p4 }
  0x10   :  { %p822_p7 = pnand %p821_p6, %p815_p3 }
  0x12   :  { %825 = shalt.err (!%p822_p7)
}
  0x13   :  { %s924_s27 = smov 64   ;;  %s925_s28 = smov 4  }
  0x14   :  { %36 = dma.hbm_to_vmem [thread:$0]  %s1046_s1, 2048, %s31_s16, [#allocation7], %s924_s27, %s924_s27, %s925_s28  }
  0x15   :  { %s826_s7 = scalar_lea.hbm %s1045_s0, 128 }
  0x16   :  { %p827_p8 = scmp.ne.s32.totalorder %s1045_s0, %s826_s7  ;;  %p830_p9 = scmp.lt.u32.totalorder %s826_s7, %s1045_s0 }
  0x18   :  { %p832_p10 = pnand %p830_p9, %p827_p8 }
  0x1a   :  { %835 = shalt.err (!%p832_p10)
}
  0x1b   :  { %s836_s12 = scalar_lea.vmem %s956_s18, 128  ;;  %p841_p12 = scmp.lt.s32.totalorder %s956_s18, %s956_s18 }
  0x1c   :  { %p837_p11 = scmp.ne.s32.totalorder %s956_s18, %s836_s12  ;;  %p842_p13 = scmp.lt.s32.totalorder %s836_s12, %s836_s12 }
  0x1e   :  { %p843_p0 = por %p842_p13, %p841_p12 }
  0x20   :  { %p844_p1 = pnand %p843_p0, %p837_p11 }
  0x22   :  { %847 = shalt.err (!%p844_p1)
}
  0x23   :  { %24 = dma.hbm_to_vmem [thread:$0]  %s1045_s0, 128, %s956_s18, [#allocation4], %s924_s27, %s924_s27, %s925_s28  }
  0x24   :  { %s926_s14 = smov [#allocation8]   ;;  %s927_s16 = smov [#allocation9]  }
  0x25   :  { %s42_s15 = sshll.u32 %s926_s14, 4  ;;  %s54_s17 = sshll.u32 %s927_s16, 4  ;;  %s43_s15 = int_to_ptr.vmem [resolvable:$true] %s42_s15  ;;  %s993_s17 = int_to_ptr.vmem [resolvable:$true] %s54_s17 }
  0x26   :  { %s848_s21 = scalar_lea.hbm %s1047_s2, 2048 }
  0x27   :  { %p849_p2 = scmp.ne.s32.totalorder %s1047_s2, %s848_s21  ;;  %p852_p3 = scmp.lt.u32.totalorder %s848_s21, %s1047_s2 }
  0x29   :  { %p854_p4 = pnand %p852_p3, %p849_p2 }
  0x2b   :  { %857 = shalt.err (!%p854_p4)
}
  0x2c   :  { %s858_s0 = scalar_lea.vmem %s43_s15, 2048  ;;  %p863_p6 = scmp.lt.s32.totalorder %s43_s15, %s43_s15 }
  0x2d   :  { %p859_p5 = scmp.ne.s32.totalorder %s43_s15, %s858_s0  ;;  %p864_p7 = scmp.lt.s32.totalorder %s858_s0, %s858_s0 }
  0x2f   :  { %p865_p8 = por %p864_p7, %p863_p6 }
  0x31   :  { %p866_p9 = pnand %p865_p8, %p859_p5 }
  0x33   :  { %869 = shalt.err (!%p866_p9)
}
  0x34   :  { %48 = dma.hbm_to_vmem [thread:$0]  %s1047_s2, 2048, %s43_s15, [#allocation7], %s924_s27, %s924_s27, %s925_s28  }
  0x35   :  { %s870_s5 = scalar_lea.hbm %s1048_s3, 2048 }
  0x36   :  { %p871_p10 = scmp.ne.s32.totalorder %s1048_s3, %s870_s5  ;;  %p874_p11 = scmp.lt.u32.totalorder %s870_s5, %s1048_s3 }
  0x38   :  { %p876_p12 = pnand %p874_p11, %p871_p10 }
  0x3a   :  { %879 = shalt.err (!%p876_p12)
}
  0x3b   :  { %s880_s10 = scalar_lea.vmem %s993_s17, 2048  ;;  %p885_p0 = scmp.lt.s32.totalorder %s993_s17, %s993_s17 }
  0x3c   :  { %p881_p13 = scmp.ne.s32.totalorder %s993_s17, %s880_s10  ;;  %p886_p1 = scmp.lt.s32.totalorder %s880_s10, %s880_s10 }
  0x3e   :  { %p887_p2 = por %p886_p1, %p885_p0 }
  0x40   :  { %p888_p3 = pnand %p887_p2, %p881_p13 }
  0x42   :  { %891 = shalt.err (!%p888_p3)
}
  0x43   :  { %s928_s2 = smov 128   ;;  %s929_s27 = smov 8  }
  0x44   :  { %60 = dma.hbm_to_vmem [thread:$0]  %s1048_s3, 2048, %s993_s17, [#allocation10], %s928_s2, %s928_s2, %s929_s27  }
  0x45   :  { %914 = dma.done.wait [#allocation4], 128  }
  0x46   :  { %915 = vsyncadd [#allocation4], 4294967168 }
  0x47   :  { %916 = dma.done.wait [#allocation7], 4096  }
  0x48   :  { %917 = vsyncadd [#allocation7], 4294963200 }
  0x49   :  { %918 = dma.done.wait [#allocation10], 2048  }
  0x4a   :  { %919 = vsyncadd [#allocation10], 4294965248  ;;  %v731_v0 = vld [vmem:[#allocation6 + $0x40] sm:$0xff]   ;;  %v733_v2 = vld [vmem:[#allocation6 + $0x48] sm:$0xff]   ;;  %s930_s3 = smov [#allocation11]  }
  0x4b   :  { %v732_v1 = vld [vmem:[#allocation6] sm:$0xff]   ;;  %686 = vmatprep.subr.bf16.mxu0 %v731_v0  ;;  %v734_v3 = vld [vmem:[#allocation6 + $0x8] sm:$0xff]   ;;  %v735_v4 = vld [vmem:[#allocation6 + $0x50] sm:$0xff]   ;;  %s619_s12 = sshll.u32 %s930_s3, 4  ;;  %s620_s12 = int_to_ptr.vmem [resolvable:$true] %s619_s12 }
  0x4c   :  { %687 = vmatpush3.bf16.xpose.msra.mxu0 %v732_v1  ;;  %v739_v5 = vld [vmem:[#allocation8 + $0x40] sm:$0xff]   ;;  %v743_v7 = vld [vmem:[#allocation8 + $0x48] sm:$0xff]   ;;  %v736_v8 = vld [vmem:[#allocation6 + $0x10] sm:$0xff]   ;;  %s892_s1 = scalar_lea.vmem %s620_s12, 256  ;;  %p897_p5 = scmp.lt.s32.totalorder %s620_s12, %s620_s12 }
  0x4d   :  { %688 = vmatprep.subr.bf16.mxu0 %v733_v2  ;;  %v740_v6 = vld [vmem:[#allocation8] sm:$0xff]   ;;  %704 = vmatprep.subr.bf16.mxu1 %v739_v5  ;;  %v737_v9 = vld [vmem:[#allocation6 + $0x58] sm:$0xff]   ;;  %v744_v10 = vld [vmem:[#allocation8 + $0x8] sm:$0xff]   ;;  %p893_p4 = scmp.ne.s32.totalorder %s620_s12, %s892_s1  ;;  %p898_p6 = scmp.lt.s32.totalorder %s892_s1, %s892_s1 }
  0x4e   :  { %705 = vmatpush3.bf16.xpose.msra.mxu1 %v740_v6  ;;  %v747_v11 = vld [vmem:[#allocation8 + $0x50] sm:$0xff]   ;;  %v738_v12 = vld [vmem:[#allocation6 + $0x18] sm:$0xff]   ;;  %v741_v13 = vld [vmem:[#allocation6 + $0x60] sm:$0xff]  }
  0x4f   :  { %706 = vmatprep.subr.bf16.mxu1 %v743_v7  ;;  %v748_v14 = vld [vmem:[#allocation8 + $0x10] sm:$0xff]   ;;  %v751_v15 = vld [vmem:[#allocation8 + $0x58] sm:$0xff]   ;;  %v742_v17 = vld [vmem:[#allocation6 + $0x20] sm:$0xff]   ;;  %p899_p7 = por %p898_p6, %p897_p5 }
  0x50   :  { %v757_v16 = vld [vmem:[#allocation3] sm:$0xff]   ;;  %v745_v18 = vld [vmem:[#allocation6 + $0x68] sm:$0xff]   ;;  %v755_v20 = vld [vmem:[#allocation8 + $0x60] sm:$0xff]  }
  0x51   :  { %702 = vmatprep.mubr.bf16.mxu0 %v757_v16  ;;  %720 = vmatprep.mubr.bf16.mxu1 %v757_v16  ;;  %v752_v19 = vld [vmem:[#allocation8 + $0x18] sm:$0xff]   ;;  %v746_v21 = vld [vmem:[#allocation6 + $0x28] sm:$0xff]   ;;  %v756_v22 = vld [vmem:[#allocation8 + $0x20] sm:$0xff]   ;;  %p900_p8 = pnand %p899_p7, %p893_p4 }
  0x52   :  { %v749_v23 = vld [vmem:[#allocation6 + $0x70] sm:$0xff]   ;;  %v758_v24 = vld [vmem:[#allocation8 + $0x68] sm:$0xff]   ;;  %v753_v27 = vld [vmem:[#allocation6 + $0x78] sm:$0xff]  }
  0x53   :  { %v750_v25 = vld [vmem:[#allocation6 + $0x30] sm:$0xff]   ;;  %v759_v26 = vld [vmem:[#allocation8 + $0x28] sm:$0xff]   ;;  %v754_v29 = vld [vmem:[#allocation6 + $0x38] sm:$0xff]  }
  0x54   :  { %689 = vmatpush3.bf16.xpose.msra.mxu0 %v734_v3  ;;  %v760_v28 = vld [vmem:[#allocation8 + $0x70] sm:$0xff]   ;;  %v762_v31 = vld [vmem:[#allocation8 + $0x78] sm:$0xff]   ;;  %v766_v32 = vld [vmem:[#allocation9 + $0x4] ss:$8 sps:$4 sm:$0xff]  }
  0x55   :  { %690 = vmatprep.subr.bf16.mxu0 %v735_v4  ;;  %v761_v30 = vld [vmem:[#allocation8 + $0x30] sm:$0xff]   ;;  %v763_v33 = vld [vmem:[#allocation8 + $0x38] sm:$0xff]   ;;  %v764_v34 = vld [vmem:[#allocation9] ss:$8 sps:$4 sm:$0xff]  }
  0x56   :  { %707 = vmatpush3.bf16.xpose.msra.mxu1 %v744_v10  ;;  %v769_v35 = vld [vmem:[#allocation9 + $0x14] ss:$8 sps:$4 sm:$0xff]   ;;  %v767_v36 = vld [vmem:[#allocation9 + $0x10] ss:$8 sps:$4 sm:$0xff]   ;;  %v772_v37 = vld [vmem:[#allocation9 + $0x24] ss:$8 sps:$4 sm:$0xff]  }
  0x57   :  { %708 = vmatprep.subr.bf16.mxu1 %v747_v11  ;;  %v770_v38 = vld [vmem:[#allocation9 + $0x20] ss:$8 sps:$4 sm:$0xff]   ;;  %v775_v39 = vld [vmem:[#allocation9 + $0x34] ss:$8 sps:$4 sm:$0xff]   ;;  %v773_v40 = vld [vmem:[#allocation9 + $0x30] ss:$8 sps:$4 sm:$0xff]  }
  0x58   :  { %v778_v41 = vld [vmem:[#allocation9 + $0x44] ss:$8 sps:$4 sm:$0xff]   ;;  %v776_v42 = vld [vmem:[#allocation9 + $0x40] ss:$8 sps:$4 sm:$0xff]   ;;  %v781_v43 = vld [vmem:[#allocation9 + $0x54] ss:$8 sps:$4 sm:$0xff]  }
  0x59   :  { %v779_v44 = vld [vmem:[#allocation9 + $0x50] ss:$8 sps:$4 sm:$0xff]   ;;  %v784_v45 = vld [vmem:[#allocation9 + $0x64] ss:$8 sps:$4 sm:$0xff]   ;;  %v782_v46 = vld [vmem:[#allocation9 + $0x60] ss:$8 sps:$4 sm:$0xff]  }
  0x5a   :  { %v787_v47 = vld [vmem:[#allocation9 + $0x74] ss:$8 sps:$4 sm:$0xff]   ;;  %v785_v48 = vld [vmem:[#allocation9 + $0x70] ss:$8 sps:$4 sm:$0xff]  }
  0x5c   :  { %691 = vmatpush3.bf16.xpose.msra.mxu0 %v736_v8 }
  0x5d   :  { %692 = vmatprep.subr.bf16.mxu0 %v737_v9 }
  0x5e   :  { %709 = vmatpush3.bf16.xpose.msra.mxu1 %v748_v14 }
  0x5f   :  { %710 = vmatprep.subr.bf16.mxu1 %v751_v15 }
  0x64   :  { %693 = vmatpush3.bf16.xpose.msra.mxu0 %v738_v12 }
  0x65   :  { %694 = vmatprep.subr.bf16.mxu0 %v741_v13 }
  0x66   :  { %711 = vmatpush3.bf16.xpose.msra.mxu1 %v752_v19 }
  0x67   :  { %712 = vmatprep.subr.bf16.mxu1 %v755_v20 }
  0x6c   :  { %695 = vmatpush3.bf16.xpose.msra.mxu0 %v742_v17 }
  0x6d   :  { %696 = vmatprep.subr.bf16.mxu0 %v745_v18 }
  0x6e   :  { %713 = vmatpush3.bf16.xpose.msra.mxu1 %v756_v22 }
  0x6f   :  { %714 = vmatprep.subr.bf16.mxu1 %v758_v24 }
  0x74   :  { %697 = vmatpush3.bf16.xpose.msra.mxu0 %v746_v21 }
  0x75   :  { %698 = vmatprep.subr.bf16.mxu0 %v749_v23 }
  0x76   :  { %715 = vmatpush3.bf16.xpose.msra.mxu1 %v759_v26 }
  0x77   :  { %716 = vmatprep.subr.bf16.mxu1 %v760_v28 }
  0x7c   :  { %699 = vmatpush3.bf16.xpose.msra.mxu0 %v750_v25 }
  0x7d   :  { %700 = vmatprep.subr.bf16.mxu0 %v753_v27 }
  0x7e   :  { %717 = vmatpush3.bf16.xpose.msra.mxu1 %v761_v30 }
  0x7f   :  { %718 = vmatprep.subr.bf16.mxu1 %v762_v31 }
  0x84   :  { %701 = vmatpush3.bf16.xpose.msra.mxu0 %v754_v29 }
  0x85   :  { %560 = vmatprep.subr.bf16.mxu0 %v766_v32 }
  0x86   :  { %719 = vmatpush3.bf16.xpose.msra.mxu1 %v763_v33 }
  0x8b   :  { %703 = vmatmul.mubr.bf16.vlgmr.msra.gmra.mrb[0].mxu0 %v757_v16 }
  0x8c   :  { %561 = vmatpush1.bf16.xpose.msra.mxu0 %v764_v34 }
  0x8d   :  { %562 = vmatprep.subr.bf16.mxu0 %v769_v35  ;;  %721 = vmatmul.mubr.bf16.vlgmr.msra.gmra.mrb[0].mxu1 %v757_v16 }
  0x94   :  { %563 = vmatpush1.bf16.xpose.msra.mxu0 %v767_v36 }
  0x95   :  { %564 = vmatprep.subr.bf16.mxu0 %v772_v37 }
  0x9c   :  { %565 = vmatpush1.bf16.xpose.msra.mxu0 %v770_v38 }
  0x9d   :  { %566 = vmatprep.subr.bf16.mxu0 %v775_v39 }
  0xa4   :  { %567 = vmatpush1.bf16.xpose.msra.mxu0 %v773_v40 }
  0xa5   :  { %568 = vmatprep.subr.bf16.mxu0 %v778_v41 }
  0xac   :  { %569 = vmatpush1.bf16.xpose.msra.mxu0 %v776_v42 }
  0xad   :  { %570 = vmatprep.subr.bf16.mxu0 %v781_v43 }
  0xb4   :  { %571 = vmatpush1.bf16.xpose.msra.mxu0 %v779_v44 }
  0xb5   :  { %572 = vmatprep.subr.bf16.mxu0 %v784_v45 }
  0xbc   :  { %573 = vmatpush1.bf16.xpose.msra.mxu0 %v782_v46 }
  0xbd   :  { %574 = vmatprep.subr.bf16.mxu0 %v787_v47 }
  0xc4   :  { %575 = vmatpush1.bf16.xpose.msra.mxu0 %v785_v48 }
 0x15e   :  { %v250_v49 = vpop.f32.mrb[0].mxu0 }
 0x15f   :  { %v666_v50 = vmul.f32 -1.442695, %v250_v49  ;;  %v252_v51 = vpop.f32.mrb[1].mxu0 }
 0x160   :  { %v667_v52 = vmul.f32 -1.442695, %v252_v51  ;;  %v254_v53 = vpop.f32.mrb[2].mxu0  ;;  %v421_v57 = vpop.f32.mrb[0].mxu1 }
 0x161   :  { %788 = vpow2.f32 %v666_v50  ;;  %v668_v54 = vmul.f32 -1.442695, %v254_v53  ;;  %v256_v55 = vpop.f32.mrb[3].mxu0  ;;  %v423_v58 = vpop.f32.mrb[1].mxu1 }
 0x162   :  { %790 = vpow2.f32 %v667_v52  ;;  %v669_v56 = vmul.f32 -1.442695, %v256_v55  ;;  %v425_v59 = vpop.f32.mrb[2].mxu1 }
 0x163   :  { %792 = vpow2.f32 %v668_v54  ;;  %v427_v60 = vpop.f32.mrb[3].mxu1 }
 0x164   :  { %794 = vpow2.f32 %v669_v56 }
 0x16b   :  { %v789_v61 = vpop.eup %788 }
 0x16c   :  { %v791_v62 = vpop.eup %790  ;;  %v442_v63 = vadd.f32 1.0, %v789_v61 }
 0x16d   :  { %v793_v0 = vpop.eup %792  ;;  %v443_v1 = vadd.f32 1.0, %v791_v62 }
 0x16e   :  { %v795_v2 = vpop.eup %794  ;;  %796 = vrcp.f32 %v442_v63  ;;  %v444_v3 = vadd.f32 1.0, %v793_v0 }
 0x16f   :  { %798 = vrcp.f32 %v443_v1  ;;  %v445_v4 = vadd.f32 1.0, %v795_v2 }
 0x170   :  { %800 = vrcp.f32 %v444_v3 }
 0x171   :  { %802 = vrcp.f32 %v445_v4 }
 0x178   :  { %v797_v5 = vpop.eup %796 }
 0x179   :  { %v799_v6 = vpop.eup %798  ;;  %v454_v7 = vmul.f32 %v797_v5, %v250_v49 }
 0x17a   :  { %v801_v8 = vpop.eup %800  ;;  %v455_v9 = vmul.f32 %v799_v6, %v252_v51 }
 0x17b   :  { %v803_v10 = vpop.eup %802  ;;  %v456_v11 = vmul.f32 %v801_v8, %v254_v53  ;;  %v458_v12 = vmul.f32 %v454_v7, %v421_v57 }
 0x17c   :  { %v457_v13 = vmul.f32 %v803_v10, %v256_v55  ;;  %v459_v14 = vmul.f32 %v455_v9, %v423_v58 }
 0x17d   :  { %v460_v15 = vmul.f32 %v456_v11, %v425_v59 }
 0x17e   :  { %v461_v16 = vmul.f32 %v457_v13, %v427_v60 }
 0x17f   :  { %v462_v17 = vpack.c.bf16 %v460_v15, %v458_v12 }
 0x180   :  { %v463_v18 = vpack.c.bf16 %v461_v16, %v459_v14 }
 0x182   :  { %592 = vmatprep.mubr.bf16.mxu0 %v463_v18 }
 0x183   :  { %593 = vmatmul.mubr.bf16.vlgmr.msra.gmra.mrb[4].mxu0 %v462_v17 }
 0x256   :  { %v594_v19 = vpop.f32.mrb[4].mxu0 }
 0x257   :  { %612 = vst [vmem:[#allocation11] sm:$0xff] %v594_v19  ;;  %v596_v20 = vpop.f32.mrb[5].mxu0 }
 0x258   :  { %v597_v21 = vpop.f32.mrb[6].mxu0 }
 0x259   :  { %613 = vst [vmem:[#allocation11 + $0x8] sm:$0xff] %v597_v21  ;;  %v599_v22 = vpop.f32.mrb[7].mxu0 }
 0x25a   :  { %903 = shalt.err (!%p900_p8)
}
 0x25b   :  { %s904_s15 = scalar_lea.hbm %s1049_s4, 256 }
 0x25c   :  { %p905_p9 = scmp.ne.s32.totalorder %s1049_s4, %s904_s15  ;;  %p908_p10 = scmp.lt.u32.totalorder %s904_s15, %s1049_s4 }
 0x25e   :  { %p910_p11 = pnand %p908_p10, %p905_p9 }
 0x260   :  { %913 = shalt.err (!%p910_p11)
}
 0x261   :  { %625 = dma.vmem_to_hbm [thread:$0]  %s620_s12, 256, %s1049_s4, [#allocation5], %s928_s2, %s928_s2, %s929_s27  }
 0x262   :  { %920 = dma.done.wait [#allocation5], 256  }
 0x263   :  { %921 = vsyncadd [#allocation5], 4294967040 }
 0x264   :  { %629 = vsyncpa [#allocation4], 1 }
 0x265   :  { %630 = vsyncpa [#allocation7], 1 }
 0x266   :  { %631 = vsyncpa [#allocation10], 1 }
 0x267   :  { %632 = vsyncpa [#allocation5], 1 }

</bundles_post_ra>
